<compile_context>
chip_gen: v5e
topology: v5e:2x2
jax: 0.10.0
libtpu: 0.0.40
codegen_flags: <defaults>
</compile_context>

<pallas_src>
import jax
import jax.numpy as jnp
from jax import lax
from jax.experimental import pallas as pl
from jax.experimental.pallas import tpu as pltpu

_LANE = 128
_SUBLANE = 8


def _cdiv(a, b):
    return -(-a // b)


def _round_up(x, m):
    return (x + m - 1) // m * m


def _sublane_mult(itemsize):
    # f32 -> 8 rows per sublane tile, bf16 -> 16, int8/fp8 -> 32.
    return max(_SUBLANE, 32 // max(int(itemsize), 1))


def _budgets():
    """Generation-aware VMEM limit / per-call tile budget."""
    vmem_limit = 32 * 1024 * 1024      # conservative default (v7x: 64 MiB VMEM)
    tile_budget = 8 * 1024 * 1024
    try:
        info = pltpu.get_tpu_info()
        vmem_cap = int(getattr(info, "vmem_capacity_bytes", 0))
        if vmem_cap >= 100 * 1024 * 1024:      # v5e / v6e: 128 MiB physical VMEM
            vmem_limit = 64 * 1024 * 1024
            tile_budget = 16 * 1024 * 1024
    except Exception:
        pass
    return vmem_limit, tile_budget


def _tiling(n, d, itemsize, tile_budget):
    """Pick the batch tile (multiple of the dtype's sublane packing)."""
    sub = _sublane_mult(itemsize)
    # Apply pass holds an x tile and a z tile, each double-buffered:
    # 4 * d * itemsize bytes per row; the (1, D) params are negligible.
    row_bytes = 4 * max(d, 1) * int(itemsize)
    rows = tile_budget // row_bytes
    rows = max(sub, (rows // sub) * sub)
    rows = min(rows, 8192 if itemsize <= 2 else 4096)
    tile_n = min(rows, _round_up(n, sub))
    # Ensure >= 2 grid steps where possible so the "parallel" axis can be
    # split across both TensorCores on v7x (harmless on single-TC chips).
    if _cdiv(n, tile_n) < 2 and n > sub:
        tile_n = max(sub, _round_up(_cdiv(n, 2), sub))
    return tile_n


# ----------------------------------------------------------------------------
# Kernel 1: streaming stats pass.  Grid = (num_chunks, steps_per_chunk) with a
# "parallel" chunk axis (megacore on v7x) and an "arbitrary" reduction axis.
# Each chunk accumulates sum(x) and sum(x*x) into its own output-resident
# (1, D) partial; the wrapper combines the partials.  The ragged last tile
# (and any fully-out-of-range clamped tile) is masked with an iota compare.
# ----------------------------------------------------------------------------
def _make_stats_kernel(n, tile_n, steps_per_chunk, ragged):
    def kernel(x_ref, sum_ref, sumsq_ref):
        @pl.when(pl.program_id(1) == 0)
        def _():
            sum_ref[...] = jnp.zeros_like(sum_ref)
            sumsq_ref[...] = jnp.zeros_like(sumsq_ref)

        x = x_ref[...].astype(jnp.float32)
        if ragged:
            step = pl.program_id(0) * steps_per_chunk + pl.program_id(1)
            row = step * tile_n + lax.broadcasted_iota(jnp.int32, x.shape, 0)
            x = jnp.where(row < n, x, 0.0)
        sum_ref[...] += jnp.sum(x, axis=0, keepdims=True)
        sumsq_ref[...] += jnp.sum(x * x, axis=0, keepdims=True)

    return kernel


def _stats(x, tile_n, vmem_limit):
    n, d = x.shape
    steps_total = _cdiv(n, tile_n)
    num_chunks = 2 if steps_total >= 2 else 1
    spc = _cdiv(steps_total, num_chunks)
    ragged = (num_chunks * spc * tile_n) != n
    last_blk = steps_total - 1

    def x_index(c, i):
        # Clamp so the DMA never reads past the last valid block; clamped
        # (duplicate) tiles are fully masked off inside the kernel.
        return (jnp.minimum(c * spc + i, last_blk), 0)

    sum_p, sumsq_p = pl.pallas_call(
        _make_stats_kernel(n, tile_n, spc, ragged),
        grid=(num_chunks, spc),
        in_specs=[pl.BlockSpec((tile_n, d), x_index)],
        out_specs=(
            pl.BlockSpec((None, 1, d), lambda c, i: (c, 0, 0)),
            pl.BlockSpec((None, 1, d), lambda c, i: (c, 0, 0)),
        ),
        out_shape=(
            jax.ShapeDtypeStruct((num_chunks, 1, d), jnp.float32),
            jax.ShapeDtypeStruct((num_chunks, 1, d), jnp.float32),
        ),
        compiler_params=pltpu.CompilerParams(
            dimension_semantics=("parallel", "arbitrary"),
            vmem_limit_bytes=vmem_limit,
        ),
    )(x)
    # Combine per-chunk partials (tiny (chunks, 1, D) math).
    return jnp.sum(sum_p, axis=0), jnp.sum(sumsq_p, axis=0)   # (1, D) each


# ----------------------------------------------------------------------------
# Kernel 2: tiled affine apply.  exp(s), t are (1, D) f32 broadcasts computed
# in the wrapper (loop-invariant); the body is the memory-bound ideal: one
# load, one f32 FMA, one store per tile (cast only at the store).
# ----------------------------------------------------------------------------
def actnorm_apply_kernel(x_ref, exp_s_ref, t_ref, z_ref):
    x = x_ref[...].astype(jnp.float32)
    z_ref[...] = (x * exp_s_ref[...] + t_ref[...]).astype(z_ref.dtype)


def _apply_tiled(x, exp_s, t, tile_n, vmem_limit):
    n, d = x.shape
    grid_n = _cdiv(n, tile_n)
    return pl.pallas_call(
        actnorm_apply_kernel,
        grid=(grid_n,),
        in_specs=[
            pl.BlockSpec((tile_n, d), lambda i: (i, 0)),
            pl.BlockSpec((1, d), lambda i: (0, 0)),
            pl.BlockSpec((1, d), lambda i: (0, 0)),
        ],
        out_specs=pl.BlockSpec((tile_n, d), lambda i: (i, 0)),
        out_shape=jax.ShapeDtypeStruct((n, d), x.dtype),
        compiler_params=pltpu.CompilerParams(
            dimension_semantics=("parallel",),       # megacore on v7x
            vmem_limit_bytes=vmem_limit,
        ),
    )(x, exp_s.astype(jnp.float32), t.astype(jnp.float32))


# ----------------------------------------------------------------------------
# Wrappers
# ----------------------------------------------------------------------------
def actnorm_forward_first_batch(x):
    """First forward of ActNorm (data-dependent init): returns (z, log_det, s, t)."""
    n, d = x.shape
    vmem_limit, tile_budget = _budgets()
    tile_n = _tiling(n, d, jnp.dtype(x.dtype).itemsize, tile_budget)

    sum_x, sum_xx = _stats(x, tile_n, vmem_limit)       # (1, D) f32 each

    # Finalize (tiny (1, D) math) in the wrapper.
    nf = jnp.float32(n)
    mean = sum_x / nf
    # torch.std default is unbiased (ddof = 1); n == 1 yields inf/nan like torch.
    var = (sum_xx - nf * mean * mean) / jnp.float32(n - 1)
    var = jnp.maximum(var, 0.0)             # guard f32 cancellation -> rsqrt NaN
    exp_s = lax.rsqrt(var)                  # exp(s) = 1/std (no sqrt->log->exp chain)
    s = -0.5 * jnp.log(var)                 # -log(std)
    t = -mean * exp_s                       # -(x * exp(s)).mean(dim=0)
    log_det = jnp.sum(s, axis=1)            # (1,)

    z = _apply_tiled(x, exp_s, t, tile_n, vmem_limit)
    return z, log_det, s, t


def actnorm_forward(x, s, t):
    """Forward after data-dependent init is done: returns (z, log_det)."""
    n, d = x.shape
    vmem_limit, tile_budget = _budgets()
    tile_n = _tiling(n, d, jnp.dtype(x.dtype).itemsize, tile_budget)

    # Loop-invariant (1, D) math hoisted out of the per-tile kernel body.
    s32 = s.astype(jnp.float32)
    exp_s = jnp.exp(s32)
    log_det = jnp.sum(s32, axis=1)          # (1,)

    z = _apply_tiled(x, exp_s, t, tile_n, vmem_limit)
    return z, log_det


if __name__ == "__main__":
    key = jax.random.PRNGKey(0)
    k_x, k_x2, k_y = jax.random.split(key, 3)

    # NOTE: the module's __init__ draws random s, t, but ActNorm overwrites
    # them on the very first forward, so we skip that here.
    N, D = 8, 32  # batch=8, dim=32

    x = jax.random.normal(k_x, (N, D), dtype=jnp.float32) * 3.0 + 1.5

    # First forward: data-dependent init (stats pass) + tiled affine apply.
    z, log_det, s, t = actnorm_forward_first_batch(x)
    jax.block_until_ready((z, log_det, s, t))

    # Pure-JAX reference for the first forward.
    std_ref = jnp.std(x, axis=0, keepdims=True, ddof=1)
    s_ref = -jnp.log(std_ref)
    t_ref = -jnp.mean(x * jnp.exp(s_ref), axis=0, keepdims=True)
    z_ref = x * jnp.exp(s_ref) + t_ref
    ld_ref = jnp.sum(s_ref, axis=1)
    assert jnp.allclose(z, z_ref, atol=1e-4, rtol=1e-4)
    assert jnp.allclose(log_det, ld_ref, atol=1e-4, rtol=1e-4)
    assert jnp.allclose(s, s_ref, atol=1e-4, rtol=1e-4)
    assert jnp.allclose(t, t_ref, atol=1e-4, rtol=1e-4)

    # Second forward: uses stored (s, t) — plain AffineConstantFlow.forward.
    x2 = jax.random.normal(k_x2, (N, D), dtype=jnp.float32)
    z2, log_det2 = actnorm_forward(x2, s, t)
    jax.block_until_ready((z2, log_det2))
    z2_ref = x2 * jnp.exp(s_ref) + t_ref
    assert jnp.allclose(z2, z2_ref, atol=1e-4, rtol=1e-4)
    assert jnp.allclose(log_det2, ld_ref, atol=1e-4, rtol=1e-4)

    # Ragged case: N not a multiple of the tile, D not a multiple of 128.
    # Exercises the in-kernel mask (no host-side padding anywhere).
    Nr, Dr = 37, 96
    y = jax.random.normal(k_y, (Nr, Dr), dtype=jnp.float32) * 2.0 - 0.5
    zy, ldy, sy, ty = actnorm_forward_first_batch(y)
    jax.block_until_ready((zy, ldy, sy, ty))
    stdy = jnp.std(y, axis=0, keepdims=True, ddof=1)
    sy_ref = -jnp.log(stdy)
    ty_ref = -jnp.mean(y * jnp.exp(sy_ref), axis=0, keepdims=True)
    zy_ref = y * jnp.exp(sy_ref) + ty_ref
    assert jnp.allclose(zy, zy_ref, atol=1e-4, rtol=1e-4)
    assert jnp.allclose(ldy, jnp.sum(sy_ref, axis=1), atol=1e-4, rtol=1e-4)
    assert jnp.allclose(sy, sy_ref, atol=1e-4, rtol=1e-4)
    assert jnp.allclose(ty, ty_ref, atol=1e-4, rtol=1e-4)

    print("KERNEL_OK")
</pallas_src>

<mosaic_0001>
module attributes {stable_mosaic.version = 11 : i64} {
  func.func @kernel(%arg0: i32, %arg1: i32, %arg2: memref<8x32xf32, #tpu.memory_space<vmem>>, %arg3: memref<1x1x32xf32, #tpu.memory_space<vmem>>, %arg4: memref<1x1x32xf32, #tpu.memory_space<vmem>>) attributes {dimension_semantics = [#tpu.dimension_semantics<parallel>, #tpu.dimension_semantics<arbitrary>], iteration_bounds = array<i64: 1, 1>, scalar_prefetch = 0 : i64, scratch_operands = 0 : i64, tpu.core_type = #tpu.core_type<tc>, window_params = [{transform_indices = @transform_0, window_bounds = array<i64: 8, 32>}, {transform_indices = @transform_1, window_bounds = array<i64: 1, 1, 32>}, {transform_indices = @transform_2, window_bounds = array<i64: 1, 1, 32>}]} {
    %c0_i32 = arith.constant 0 : i32
    %0 = arith.cmpi eq, %arg1, %c0_i32 : i32
    %1 = arith.extui %0 : i1 to i32
    %c0_i32_0 = arith.constant 0 : i32
    %2 = arith.cmpi ne, %1, %c0_i32_0 : i32
    scf.if %2 {
      %cst_15 = arith.constant 0.000000e+00 : f32
      %21 = vector.broadcast %cst_15 : f32 to vector<1x32xf32>
      %c0_16 = arith.constant 0 : index
      %c0_17 = arith.constant 0 : index
      %c0_18 = arith.constant 0 : index
      %22 = vector.load %arg3[%c0_16, %c0_17, %c0_18] : memref<1x1x32xf32, #tpu.memory_space<vmem>>, vector<1x1x32xf32>
      %23 = vector.shape_cast %22 : vector<1x1x32xf32> to vector<1x32xf32>
      %24 = vector.shape_cast %21 : vector<1x32xf32> to vector<1x1x32xf32>
      tpu.vector_store %arg3[%c0_16, %c0_17, %c0_18], %24 {strides = array<i32>} : memref<1x1x32xf32, #tpu.memory_space<vmem>>, vector<1x1x32xf32>,
      %cst_19 = arith.constant 0.000000e+00 : f32
      %25 = vector.broadcast %cst_19 : f32 to vector<1x32xf32>
      %c0_20 = arith.constant 0 : index
      %c0_21 = arith.constant 0 : index
      %c0_22 = arith.constant 0 : index
      %26 = vector.load %arg4[%c0_20, %c0_21, %c0_22] : memref<1x1x32xf32, #tpu.memory_space<vmem>>, vector<1x1x32xf32>
      %27 = vector.shape_cast %26 : vector<1x1x32xf32> to vector<1x32xf32>
      %28 = vector.shape_cast %25 : vector<1x32xf32> to vector<1x1x32xf32>
      tpu.vector_store %arg4[%c0_20, %c0_21, %c0_22], %28 {strides = array<i32>} : memref<1x1x32xf32, #tpu.memory_space<vmem>>, vector<1x1x32xf32>,
    } else {
    }
    %c0 = arith.constant 0 : index
    %c0_1 = arith.constant 0 : index
    %3 = vector.load %arg2[%c0, %c0_1] : memref<8x32xf32, #tpu.memory_space<vmem>>, vector<8x32xf32>
    %c0_2 = arith.constant 0 : index
    %c0_3 = arith.constant 0 : index
    %c0_4 = arith.constant 0 : index
    %4 = vector.load %arg3[%c0_2, %c0_3, %c0_4] : memref<1x1x32xf32, #tpu.memory_space<vmem>>, vector<1x1x32xf32>
    %5 = vector.shape_cast %4 : vector<1x1x32xf32> to vector<1x32xf32>
    %cst = arith.constant dense<0.000000e+00> : vector<32xf32>
    %6 = vector.multi_reduction <add>, %3, %cst [0] : vector<8x32xf32> to vector<32xf32>
    %7 = vector.shape_cast %6 : vector<32xf32> to vector<1x32xf32>
    %8 = arith.addf %5, %7 : vector<1x32xf32>
    %c0_5 = arith.constant 0 : index
    %c0_6 = arith.constant 0 : index
    %c0_7 = arith.constant 0 : index
    %9 = vector.load %arg3[%c0_5, %c0_6, %c0_7] : memref<1x1x32xf32, #tpu.memory_space<vmem>>, vector<1x1x32xf32>
    %10 = vector.shape_cast %9 : vector<1x1x32xf32> to vector<1x32xf32>
    %11 = vector.shape_cast %8 : vector<1x32xf32> to vector<1x1x32xf32>
    tpu.vector_store %arg3[%c0_5, %c0_6, %c0_7], %11 {strides = array<i32>} : memref<1x1x32xf32, #tpu.memory_space<vmem>>, vector<1x1x32xf32>,
    %c0_8 = arith.constant 0 : index
    %c0_9 = arith.constant 0 : index
    %c0_10 = arith.constant 0 : index
    %12 = vector.load %arg4[%c0_8, %c0_9, %c0_10] : memref<1x1x32xf32, #tpu.memory_space<vmem>>, vector<1x1x32xf32>
    %13 = vector.shape_cast %12 : vector<1x1x32xf32> to vector<1x32xf32>
    %14 = arith.mulf %3, %3 : vector<8x32xf32>
    %cst_11 = arith.constant dense<0.000000e+00> : vector<32xf32>
    %15 = vector.multi_reduction <add>, %14, %cst_11 [0] : vector<8x32xf32> to vector<32xf32>
    %16 = vector.shape_cast %15 : vector<32xf32> to vector<1x32xf32>
    %17 = arith.addf %13, %16 : vector<1x32xf32>
    %c0_12 = arith.constant 0 : index
    %c0_13 = arith.constant 0 : index
    %c0_14 = arith.constant 0 : index
    %18 = vector.load %arg4[%c0_12, %c0_13, %c0_14] : memref<1x1x32xf32, #tpu.memory_space<vmem>>, vector<1x1x32xf32>
    %19 = vector.shape_cast %18 : vector<1x1x32xf32> to vector<1x32xf32>
    %20 = vector.shape_cast %17 : vector<1x32xf32> to vector<1x1x32xf32>
    tpu.vector_store %arg4[%c0_12, %c0_13, %c0_14], %20 {strides = array<i32>} : memref<1x1x32xf32, #tpu.memory_space<vmem>>, vector<1x1x32xf32>,
    return
  }
  func.func @transform_0(%arg0: i32, %arg1: i32) -> (i32, i32) {
    %c1_i32 = arith.constant 1 : i32
    %0 = arith.muli %arg0, %c1_i32 : i32
    %1 = arith.addi %0, %arg1 : i32
    %c0_i32 = arith.constant 0 : i32
    %2 = arith.minsi %1, %c0_i32 : i32
    %c0_i32_0 = arith.constant 0 : i32
    %c0_i32_1 = arith.constant 0 : i32
    return %2, %c0_i32_0 : i32, i32
  }
  func.func @transform_1(%arg0: i32, %arg1: i32) -> (i32, i32, i32) {
    %c0_i32 = arith.constant 0 : i32
    %c0_i32_0 = arith.constant 0 : i32
    %c0_i32_1 = arith.constant 0 : i32
    return %arg0, %c0_i32, %c0_i32_0 : i32, i32, i32
  }
  func.func @transform_2(%arg0: i32, %arg1: i32) -> (i32, i32, i32) {
    %c0_i32 = arith.constant 0 : i32
    %c0_i32_0 = arith.constant 0 : i32
    %c0_i32_1 = arith.constant 0 : i32
    return %arg0, %c0_i32, %c0_i32_0 : i32, i32, i32
  }
}

</mosaic_0001>

<bundles_post_ra>
// kernel: tpu_custom_call.1
= control target key start
LH: loop header
LB: loop body
LE: loop exit
PB: predicated region body
PF: predicated region fallthrough
CT: control target
= control target key end

     0   :  { %8 = vsyncpa [#allocation3], 0  ;;  %s214_s0 = inlined_call_operand.hbm [shape: f32[8,32], index: 0, kind: input, shape index: {}]   ;;  %s215_s1 = inlined_call_operand.hbm [shape: f32[1,1,32], index: 1, kind: output, shape index: {0}]   ;;  %s216_s2 = inlined_call_operand.hbm [shape: f32[1,1,32], index: 2, kind: output, shape index: {1}]  }
   0x1   :  { %9 = vsyncpa [#allocation4], 0 }
   0x2   :  { %10 = vsyncpa [#allocation7], 0  ;;  %s21_s11 = sshll.u32 %s214_s0, 4  ;;  %s182_s12 = smov [#allocation2]   ;;  %s22_s11 = int_to_ptr.hbm [resolvable:$true] %s21_s11 }
   0x3   :  { %s23_s13 = sshll.u32 %s182_s12, 4  ;;  %s24_s13 = int_to_ptr.vmem [resolvable:$true] %s23_s13 }
   0x4   :  { %26 = dma.hbm_to_vmem [thread:$0]  %s22_s11, 128, %s24_s13, [#allocation3]  }
   0x5   :  { %176 = dma.done.wait [#allocation3], 128  }
   0x6   :  { %177 = vsyncadd [#allocation3], 4294967168  ;;  %vm38_vm0 = vcmask 253952   ;;  %v183_v0 = vmov 0.0   ;;  %vm43_vm1 = vcmask 261120   ;;  %v41_v1 = vld [vmem:[#allocation2] sm:$0xff] }
   0x7   :  { %39 = vst.msk [vmem:[#allocation5] sm:$0x1] %vm38_vm0, %v183_v0  ;;  %v44_v2 = vsel %vm43_vm1, %v41_v1, 0.0  ;;  %v55_v3 = vmul.f32 %v41_v1, %v41_v1  ;;  %s184_s0 = smov [#allocation5]   ;;  %s72_s17 = sshll.u32 %s215_s1, 4  ;;  %s73_s17 = int_to_ptr.hbm [resolvable:$true] %s72_s17 }
   0x8   :  { %40 = vst.msk [vmem:[#allocation6] sm:$0x1] %vm38_vm0, %v183_v0  ;;  %v45_v4 = vrot.slane %v44_v2, 4  ;;  %s70_s14 = sshll.u32 %s184_s0, 4  ;;  %s185_s18 = smov [#allocation6]   ;;  %s71_s14 = int_to_ptr.vmem [resolvable:$true] %s70_s14 }
   0x9   :  { %v56_v5 = vsel %vm43_vm1, %v55_v3, 0.0  ;;  %s81_s19 = sshll.u32 %s185_s18, 4  ;;  %s83_s22 = sshll.u32 %s216_s2, 4  ;;  %s82_s19 = int_to_ptr.vmem [resolvable:$true] %s81_s19  ;;  %s84_s22 = int_to_ptr.hbm [resolvable:$true] %s83_s22 }
   0xa   :  { %v46_v6 = vadd.f32 %v45_v4, %v44_v2  ;;  %v57_v7 = vrot.slane %v56_v5, 4 }
   0xc   :  { %v47_v8 = vrot.slane %v46_v6, 2  ;;  %v58_v9 = vadd.f32 %v57_v7, %v56_v5 }
   0xe   :  { %v48_v10 = vadd.f32 %v47_v8, %v46_v6  ;;  %v59_v11 = vrot.slane %v58_v9, 2  ;;  %v42_v14 = vld [vmem:[#allocation5] sm:$0x1] }
   0xf   :  { %v54_v17 = vld [vmem:[#allocation6] sm:$0x1] }
  0x10   :  { %v49_v12 = vrot.slane %v48_v10, 1  ;;  %v60_v13 = vadd.f32 %v59_v11, %v58_v9 }
  0x12   :  { %v50_v15 = vadd.f32 %v49_v12, %v48_v10  ;;  %v61_v16 = vrot.slane %v60_v13, 1 }
  0x14   :  { %v51_v18 = vadd.f32 %v50_v15, %v42_v14  ;;  %v62_v19 = vadd.f32 %v61_v16, %v60_v13 }
  0x16   :  { %53 = vst.msk [vmem:[#allocation5] sm:$0x1] %vm38_vm0, %v51_v18  ;;  %v63_v20 = vadd.f32 %v62_v19, %v54_v17 }
  0x17   :  { %75 = dma.vmem_to_hbm [thread:$0]  %s71_s14, 16, %s73_s17, [#allocation4]  }
  0x18   :  { %64 = vst.msk [vmem:[#allocation6] sm:$0x1] %vm38_vm0, %v63_v20 }
  0x19   :  { %86 = dma.vmem_to_hbm [thread:$0]  %s82_s19, 16, %s84_s22, [#allocation7]  }
  0x1a   :  { %178 = dma.done.wait [#allocation4], 16  }
  0x1b   :  { %179 = vsyncadd [#allocation4], 4294967280 }
  0x1c   :  { %180 = dma.done.wait [#allocation7], 16  }
  0x1d   :  { %181 = vsyncadd [#allocation7], 4294967280 }
  0x1e   :  { %95 = vsyncpa [#allocation3], 1 }
  0x1f   :  { %96 = vsyncpa [#allocation4], 1 }
  0x20   :  { %97 = vsyncpa [#allocation7], 1 }

</bundles_post_ra>
